<compile_context>
chip_gen: v7x
topology: tpu7x:2x2x1
jax: 0.10.0
libtpu: 0.0.40
codegen_flags: <defaults>
</compile_context>

<pallas_src>
import functools
import math

import jax
import jax.numpy as jnp
from jax import lax
from jax.experimental import pallas as pl
from jax.experimental.pallas import tpu as pltpu


def _attention_kernel(enc_ref, hidp_ref, w_eT_ref, v_ref, out_ref, *, t_valid):
    """Attention over a block of batch rows.

    enc_ref  : (Bblk, T_pad, H) bf16  encoder outputs (T padded to mult. of 16)
    hidp_ref : (Bblk, H)        f32   precomputed hidden @ W_h^T + b
    w_eT_ref : (H, H)           bf16  encoder half of attn weight, transposed
    v_ref    : (1, H)           f32   attention vector v
    out_ref  : (Bblk, T_pad)    f32   softmax(energies) over the valid T
    """
    bblk, t_pad, h = enc_ref.shape

    # Encoder projection on the MXU: bf16 x bf16 -> f32 accumulate.
    # T_pad % 16 == 0, so merging (Bblk, T_pad) into MXU rows is layout
    # preserving (no VMEM relayout copy).
    enc2d = enc_ref[...].reshape(bblk * t_pad, h)                     # (Bblk*T, H)
    pre = jnp.dot(enc2d, w_eT_ref[...],
                  preferred_element_type=jnp.float32)                 # (Bblk*T, H)
    pre = pre.reshape(bblk, t_pad, h)                                 # (Bblk, T, H)

    # Linear(cat([hidden, enc])) == enc @ W_e^T + (hidden @ W_h^T + b);
    # the second term is precomputed in the wrapper and broadcast here.
    energy = jnp.tanh(pre + hidp_ref[...][:, None, :])                # f32

    # score = <v, energy> along H: multiply + cross-lane reduce (XLU).
    score = jnp.sum(energy * v_ref[...][None], axis=-1)               # (Bblk, T)

    # Mask padded timesteps out of the softmax (static no-op when T%16==0).
    if t_pad != t_valid:
        lane = lax.broadcasted_iota(jnp.int32, (bblk, t_pad), 1)
        score = jnp.where(lane < t_valid, score, -1e30)

    # Numerically-stable softmax over T; EUP approximate reciprocal.
    m = jnp.max(score, axis=-1, keepdims=True)
    p = jnp.exp(score - m)
    denom = jnp.sum(p, axis=-1, keepdims=True)
    out_ref[...] = (p * pl.reciprocal(denom, approx=True)).astype(out_ref.dtype)


def _vmem_params():
    """Per-generation (total-footprint budget, scoped VMEM limit) in bytes."""
    try:
        kind = jax.devices()[0].device_kind.lower()
    except Exception:
        kind = ""
    if "v5 lite" in kind or "v5e" in kind or "v5lite" in kind:
        # 128 MiB physical, 16 MiB default scoped limit -> raise it.
        return 24 << 20, 80 << 20
    if "v6" in kind:
        # 128 MiB physical, single TC: big tiles amortize per-step overhead.
        return 40 << 20, 100 << 20
    if "v7" in kind or "7x" in kind:
        # 64 MiB physical per TC: budget conservatively, leave headroom.
        return 20 << 20, 48 << 20
    return 16 << 20, 48 << 20


def _choose_b_block(B, t_pad, H, budget_bytes):
    """Largest batch block that (a) satisfies the (8,128) block constraint,
    (b) fits the VMEM budget including f32 temporaries and double-buffering,
    and (c) keeps the grid >= 2 when the batch allows it."""
    cands = [d for d in range(8, B + 1, 8) if B % d == 0]
    if not cands:
        return B  # no multiple-of-8 divisor: one grid step over the whole batch

    def footprint(bb):
        blk = bb * t_pad * H
        return (blk * 2 * 2           # bf16 encoder block, double-buffered
                + blk * 4 * 3         # f32 intermediates (pre / energy / product)
                + bb * H * 4 * 2      # f32 hid_proj block, double-buffered
                + bb * t_pad * 4 * 2  # f32 output block, double-buffered
                + H * H * 2 * 2)      # bf16 weight, double-buffered

    fitting = [bb for bb in cands if footprint(bb) <= budget_bytes]
    if not fitting:
        return cands[0]
    grid2 = [bb for bb in fitting if B // bb >= 2]   # keep 2 TCs / pipeline busy
    pool = grid2 if grid2 else fitting
    return max(pool)


def attention_pallas(hidden, encoder_outputs, w, b, v, *, b_block=None):
    """hidden: (1, B, H), encoder_outputs: (B, T, H) -> (B, 1, T) float32."""
    B, T, H = encoder_outputs.shape
    hidden2d = hidden[0]                                              # (B, H)

    # Split the Linear weight once (PyTorch cat order is [hidden, enc]).
    w_h = w[:, :H]
    w_e = w[:, H:]

    # Hoist the hidden projection (+ bias) out of the kernel: one full-size
    # XLA matmul in f32; the kernel only broadcast-adds it along T.
    hid_proj = (hidden2d.astype(jnp.float32) @ jnp.transpose(w_h).astype(jnp.float32)
                + b.astype(jnp.float32))                              # (B, H) f32

    # Pad T to a multiple of 16 (bf16 sublane granule) so the in-kernel row
    # merge is layout-preserving; padded timesteps are masked in the kernel.
    t_pad = ((T + 15) // 16) * 16
    enc = encoder_outputs
    if t_pad != T:
        enc = jnp.pad(enc, ((0, 0), (0, t_pad - T), (0, 0)))

    # MXU operands in bf16 (accumulation stays f32 inside the kernel).
    enc_bf16 = enc.astype(jnp.bfloat16)                               # (B, T_pad, H)
    w_eT = jnp.transpose(w_e).astype(jnp.bfloat16)                    # (H, H)
    v2d = v.reshape(1, H).astype(jnp.float32)

    budget, vmem_limit = _vmem_params()
    if b_block is None:
        b_block = _choose_b_block(B, t_pad, H, budget)
    assert B % b_block == 0, (B, b_block)
    grid = (B // b_block,)

    cost = pl.CostEstimate(
        flops=2 * B * t_pad * H * H,
        transcendentals=B * t_pad * H + B * t_pad,
        bytes_accessed=(B * t_pad * H * 2     # bf16 encoder
                        + B * H * 4           # f32 hid_proj
                        + H * H * 2 + H * 4   # weight + v
                        + B * t_pad * 4),     # f32 output
    )

    kernel = functools.partial(_attention_kernel, t_valid=T)

    out2d = pl.pallas_call(
        kernel,
        out_shape=jax.ShapeDtypeStruct((B, t_pad), jnp.float32),
        grid_spec=pltpu.PrefetchScalarGridSpec(
            num_scalar_prefetch=0,
            grid=grid,
            in_specs=[
                pl.BlockSpec((b_block, t_pad, H), lambda bi: (bi, 0, 0)),  # encoder
                pl.BlockSpec((b_block, H), lambda bi: (bi, 0)),            # hid_proj
                pl.BlockSpec((H, H), lambda bi: (0, 0)),                   # W_e^T
                pl.BlockSpec((1, H), lambda bi: (0, 0)),                   # v
            ],
            # Lane-dense output: T_pad on the lane axis, no size-1 dims.
            out_specs=pl.BlockSpec((b_block, t_pad), lambda bi: (bi, 0)),
        ),
        compiler_params=pltpu.CompilerParams(
            dimension_semantics=("parallel",),
            vmem_limit_bytes=vmem_limit,
        ),
        cost_estimate=cost,
    )(enc_bf16, hid_proj, w_eT, v2d)

    # Free layout plumbing back to the PyTorch output shape (drop T padding).
    return out2d[:, :T].reshape(B, 1, T)


def attention_ref(hidden, encoder_outputs, w, b, v):
    """Pure-JAX f32 reference mirroring the PyTorch forward exactly."""
    B, T, H = encoder_outputs.shape
    h = jnp.broadcast_to(hidden, (T, B, H)).transpose(1, 0, 2)        # (B, T, H)
    x = jnp.concatenate([h, encoder_outputs], axis=2)                 # (B, T, 2H)
    energy = jnp.tanh(x @ w.T + b)                                    # (B, T, H)
    energy = energy.transpose(0, 2, 1)                                # (B, H, T)
    vv = jnp.broadcast_to(v, (B, H))[:, None, :]                      # (B, 1, H)
    attn_energies = jnp.einsum("bih,bht->bit", vv, energy)            # (B, 1, T)
    return jax.nn.softmax(attn_energies, axis=2)


if __name__ == "__main__":
    # Small shapes consistent with the module's forward.
    B, T, H = 2, 8, 32

    key = jax.random.PRNGKey(0)
    k_hid, k_enc, k_w, k_b, k_v = jax.random.split(key, 5)

    hidden = jax.random.normal(k_hid, (1, B, H), dtype=jnp.float32)
    encoder_outputs = jax.random.normal(k_enc, (B, T, H), dtype=jnp.float32)

    # Deterministic parameter init mirroring nn.Linear / the module's __init__.
    lin_bound = 1.0 / math.sqrt(2 * H)
    w = jax.random.uniform(k_w, (H, 2 * H), jnp.float32, -lin_bound, lin_bound)
    b = jax.random.uniform(k_b, (H,), jnp.float32, -lin_bound, lin_bound)
    v_bound = 1.0 / math.sqrt(H)
    v = jax.random.uniform(k_v, (H,), jnp.float32, -v_bound, v_bound)

    out = attention_pallas(hidden, encoder_outputs, w, b, v)
    out = jax.block_until_ready(out)

    ref = attention_ref(hidden, encoder_outputs, w, b, v)
    assert out.shape == (B, 1, T), out.shape
    # Tolerance accounts for bf16 MXU operands (f32 accumulation) and the EUP
    # approximate reciprocal in the softmax; observed error is ~1e-4 on probs.
    assert jnp.allclose(out, ref, atol=2e-3, rtol=2e-3), (
        f"max abs diff {jnp.max(jnp.abs(out - ref))}"
    )
    # Rows must (approximately) sum to 1.
    assert jnp.allclose(jnp.sum(out, axis=-1), 1.0, atol=2e-3)

    print("KERNEL_OK")
</pallas_src>

<mosaic_0001>
module attributes {stable_mosaic.version = 11 : i64} {
  func.func @_attention_kernel(%arg0: i32, %arg1: memref<2x16x32xbf16, #tpu.memory_space<vmem>>, %arg2: memref<2x32xf32, #tpu.memory_space<vmem>>, %arg3: memref<32x32xbf16, #tpu.memory_space<vmem>>, %arg4: memref<1x32xf32, #tpu.memory_space<vmem>>, %arg5: memref<2x16xf32, #tpu.memory_space<vmem>>) attributes {dimension_semantics = [#tpu.dimension_semantics<parallel>], iteration_bounds = array<i64: 1>, scalar_prefetch = 0 : i64, scratch_operands = 0 : i64, tpu.core_type = #tpu.core_type<tc>, window_params = [{transform_indices = @transform_0, window_bounds = array<i64: 2, 16, 32>}, {transform_indices = @transform_1, window_bounds = array<i64: 2, 32>}, {pipeline_mode = #tpu.pipeline_mode<synchronous>, transform_indices = @transform_2, window_bounds = array<i64: 32, 32>}, {pipeline_mode = #tpu.pipeline_mode<synchronous>, transform_indices = @transform_3, window_bounds = array<i64: 1, 32>}, {transform_indices = @transform_4, window_bounds = array<i64: 2, 16>}]} {
    %c0 = arith.constant 0 : index
    %c0_0 = arith.constant 0 : index
    %c0_1 = arith.constant 0 : index
    %0 = vector.load %arg1[%c0, %c0_0, %c0_1] : memref<2x16x32xbf16, #tpu.memory_space<vmem>>, vector<2x16x32xbf16>
    %1 = vector.shape_cast %0 : vector<2x16x32xbf16> to vector<32x32xbf16>
    %c0_2 = arith.constant 0 : index
    %c0_3 = arith.constant 0 : index
    %2 = vector.load %arg3[%c0_2, %c0_3] : memref<32x32xbf16, #tpu.memory_space<vmem>>, vector<32x32xbf16>
    %cst = arith.constant dense<0.000000e+00> : vector<32x32xf32>
    %3 = tpu.matmul %1, %2, %cst {dimension_numbers = #tpu.dot_dimension_numbers<[1], [0], [0], [1], [0, 0, 1, 1], [], []>} : vector<32x32xbf16>, vector<32x32xbf16>, vector<32x32xf32> -> vector<32x32xf32>
    %4 = vector.shape_cast %3 : vector<32x32xf32> to vector<2x16x32xf32>
    %c0_4 = arith.constant 0 : index
    %c0_5 = arith.constant 0 : index
    %5 = vector.load %arg2[%c0_4, %c0_5] : memref<2x32xf32, #tpu.memory_space<vmem>>, vector<2x32xf32>
    %6 = vector.shape_cast %5 : vector<2x32xf32> to vector<2x1x32xf32>
    %7 = vector.broadcast %6 : vector<2x1x32xf32> to vector<2x16x32xf32>
    %8 = arith.addf %4, %7 : vector<2x16x32xf32>
    %9 = math.tanh %8 : vector<2x16x32xf32>
    %c0_6 = arith.constant 0 : index
    %c0_7 = arith.constant 0 : index
    %10 = vector.load %arg4[%c0_6, %c0_7] : memref<1x32xf32, #tpu.memory_space<vmem>>, vector<1x32xf32>
    %11 = vector.shape_cast %10 : vector<1x32xf32> to vector<1x1x32xf32>
    %12 = vector.broadcast %11 : vector<1x1x32xf32> to vector<2x16x32xf32>
    %13 = arith.mulf %9, %12 : vector<2x16x32xf32>
    %cst_8 = arith.constant dense<0.000000e+00> : vector<2x16xf32>
    %14 = vector.multi_reduction <add>, %13, %cst_8 [2] : vector<2x16x32xf32> to vector<2x16xf32>
    %15 = tpu.iota {dimensions = array<i32: 1>} : vector<2x16xi32>
    %c8_i32 = arith.constant 8 : i32
    %16 = vector.broadcast %c8_i32 : i32 to vector<2x16xi32>
    %17 = arith.cmpi slt, %15, %16 : vector<2x16xi32>
    %cst_9 = arith.constant -1.000000e+30 : f32
    %18 = vector.broadcast %cst_9 : f32 to vector<2x16xf32>
    %19 = arith.select %17, %14, %18 : vector<2x16xi1>, vector<2x16xf32>
    %cst_10 = arith.constant dense<0xFF800000> : vector<2xf32>
    %20 = vector.multi_reduction <maximumf>, %19, %cst_10 [1] : vector<2x16xf32> to vector<2xf32>
    %21 = vector.shape_cast %20 : vector<2xf32> to vector<2x1xf32>
    %22 = vector.broadcast %21 : vector<2x1xf32> to vector<2x16xf32>
    %23 = arith.subf %19, %22 : vector<2x16xf32>
    %24 = math.exp %23 : vector<2x16xf32>
    %cst_11 = arith.constant dense<0.000000e+00> : vector<2xf32>
    %25 = vector.multi_reduction <add>, %24, %cst_11 [1] : vector<2x16xf32> to vector<2xf32>
    %26 = vector.shape_cast %25 : vector<2xf32> to vector<2x1xf32>
    %27 = tpu.reciprocal %26 {approx = true} : vector<2x1xf32> -> vector<2x1xf32>
    %28 = vector.broadcast %27 : vector<2x1xf32> to vector<2x16xf32>
    %29 = arith.mulf %24, %28 : vector<2x16xf32>
    %c0_12 = arith.constant 0 : index
    %c0_13 = arith.constant 0 : index
    %30 = vector.load %arg5[%c0_12, %c0_13] : memref<2x16xf32, #tpu.memory_space<vmem>>, vector<2x16xf32>
    tpu.vector_store %arg5[%c0_12, %c0_13], %29 {strides = array<i32>} : memref<2x16xf32, #tpu.memory_space<vmem>>, vector<2x16xf32>,
    return
  }
  func.func @transform_0(%arg0: i32) -> (i32, i32, i32) {
    %c0_i32 = arith.constant 0 : i32
    %c0_i32_0 = arith.constant 0 : i32
    %c0_i32_1 = arith.constant 0 : i32
    return %arg0, %c0_i32, %c0_i32_0 : i32, i32, i32
  }
  func.func @transform_1(%arg0: i32) -> (i32, i32) {
    %c0_i32 = arith.constant 0 : i32
    %c0_i32_0 = arith.constant 0 : i32
    return %arg0, %c0_i32 : i32, i32
  }
  func.func @transform_2(%arg0: i32) -> (i32, i32) {
    %c0_i32 = arith.constant 0 : i32
    %c0_i32_0 = arith.constant 0 : i32
    %c0_i32_1 = arith.constant 0 : i32
    return %c0_i32, %c0_i32_0 : i32, i32
  }
  func.func @transform_3(%arg0: i32) -> (i32, i32) {
    %c0_i32 = arith.constant 0 : i32
    %c0_i32_0 = arith.constant 0 : i32
    %c0_i32_1 = arith.constant 0 : i32
    return %c0_i32, %c0_i32_0 : i32, i32
  }
  func.func @transform_4(%arg0: i32) -> (i32, i32) {
    %c0_i32 = arith.constant 0 : i32
    %c0_i32_0 = arith.constant 0 : i32
    return %arg0, %c0_i32 : i32, i32
  }
}

</mosaic_0001>

<bundles_post_ra>
// kernel: tpu_custom_call.1
= control target key start
LH: loop header
LB: loop body
LE: loop exit
PB: predicated region body
PF: predicated region fallthrough
CT: control target
= control target key end

     0   :  { %9 = vsyncpa [#allocation3], 0  ;;  %s454_s0 = inlined_call_operand.hbm [shape: bf16[2,16,32], index: 0, kind: input, shape index: {}]   ;;  %s455_s1 = inlined_call_operand.vmem [shape: f32[2,32], index: 1, kind: input, shape index: {}]   ;;  %s456_s2 = inlined_call_operand.hbm [shape: bf16[32,32], index: 2, kind: input, shape index: {}]   ;;  %s457_s3 = inlined_call_operand.vmem [shape: f32[1,32], index: 3, kind: input, shape index: {}]   ;;  %s458_s4 = inlined_call_operand.hbm [shape: f32[2,16], index: 4, kind: output, shape index: {}]  }
   0x1   :  { %10 = vsyncpa [#allocation6], 0 }
   0x2   :  { %11 = vsyncpa [#allocation4], 0  ;;  %s372_s15 = smov [#allocation2]   ;;  %s300_s19 = scalar_lea.hbm %s454_s0, 256 }
   0x3   :  { %s17_s16 = sshll.u32 %s372_s15, 4  ;;  %p301_p0 = scmp.ne.s32.totalorder %s454_s0, %s300_s19  ;;  %s18_s16 = int_to_ptr.vmem [resolvable:$true] %s17_s16 }
   0x4   :  { %p304_p1 = scmp.lt.u32.totalorder %s300_s19, %s454_s0 }
   0x6   :  { %p306_p2 = pnand %p304_p1, %p301_p0 }
   0x8   :  { %309 = shalt.err (!%p306_p2)
}
   0x9   :  { %s310_s24 = scalar_lea.vmem %s18_s16, 256  ;;  %p315_p4 = scmp.lt.s32.totalorder %s18_s16, %s18_s16 }
   0xa   :  { %p311_p3 = scmp.ne.s32.totalorder %s18_s16, %s310_s24  ;;  %p316_p5 = scmp.lt.s32.totalorder %s310_s24, %s310_s24 }
   0xc   :  { %p317_p6 = por %p316_p5, %p315_p4 }
   0xe   :  { %p318_p7 = pnand %p317_p6, %p311_p3 }
  0x10   :  { %321 = shalt.err (!%p318_p7)
}
  0x11   :  { %s373_s25 = smov 64   ;;  %s374_s26 = smov 4  }
  0x12   :  { %23 = dma.hbm_to_vmem [thread:$0]  %s454_s0, 256, %s18_s16, [#allocation3], %s373_s25, %s373_s25, %s374_s26  }
  0x13   :  { %s375_s29 = smov [#allocation5]   ;;  %s322_s7 = scalar_lea.hbm %s456_s2, 256 }
  0x14   :  { %s31_s30 = sshll.u32 %s375_s29, 4  ;;  %p323_p8 = scmp.ne.s32.totalorder %s456_s2, %s322_s7  ;;  %s32_s30 = int_to_ptr.vmem [resolvable:$true] %s31_s30 }
  0x15   :  { %p326_p9 = scmp.lt.u32.totalorder %s322_s7, %s456_s2 }
  0x17   :  { %p328_p10 = pnand %p326_p9, %p323_p8 }
  0x19   :  { %331 = shalt.err (!%p328_p10)
}
  0x1a   :  { %s332_s12 = scalar_lea.vmem %s32_s30, 256  ;;  %p337_p12 = scmp.lt.s32.totalorder %s32_s30, %s32_s30 }
  0x1b   :  { %p333_p11 = scmp.ne.s32.totalorder %s32_s30, %s332_s12  ;;  %p338_p13 = scmp.lt.s32.totalorder %s332_s12, %s332_s12 }
  0x1d   :  { %p339_p0 = por %p338_p13, %p337_p12 }
  0x1f   :  { %p340_p1 = pnand %p339_p0, %p333_p11 }
  0x21   :  { %343 = shalt.err (!%p340_p1)
}
  0x22   :  { %37 = dma.hbm_to_vmem [thread:$0]  %s456_s2, 256, %s32_s30, [#allocation6], %s373_s25, %s373_s25, %s374_s26  }
  0x23   :  { %366 = dma.done.wait [#allocation3], 256  }
  0x24   :  { %367 = vsyncadd [#allocation3], 4294967040 }
  0x25   :  { %368 = dma.done.wait [#allocation6], 256  }
  0x26   :  { %369 = vsyncadd [#allocation6], 4294967040  ;;  %v284_v0 = vld [vmem:[#allocation5] sm:$0xff]   ;;  %v285_v1 = vld [vmem:[#allocation5 + $0x8] sm:$0xff]   ;;  %vm77_vm0 = vcmask 261120   ;;  %v146_v6 = vlaneseq  ;;  %vm214_vm1 = vcmask 130112  }
  0x27   :  { %270 = vmatprep.subr.bf16.mxu0 %v284_v0  ;;  %v286_v2 = vld [vmem:[#allocation2] sm:$0xff]   ;;  %v287_v3 = vld [vmem:[#allocation2 + $0x8] sm:$0xff]   ;;  %v376_v4 = vmov 1966171168   ;;  %vm225_vm2 = vcmask 1041409   ;;  %vm229_vm4 = vcmask 123904  }
  0x28   :  { %271 = vmatpush3.bf16.msra.mxu0 %v284_v0  ;;  %274 = vmatprep.mubr.msk.bf16.mxu0 %vm77_vm0, %v286_v2  ;;  %v144_v5 = vunpack.c.l.s4 %v376_v4  ;;  %v147_v8 = vshrl.u32 %v146_v6, 7  ;;  %v264_v9 = vld.sshfl [vmem:[%s455_s1] sm:$0x11 pattern:$0x75316420]  ;;  %v199_v38 = vand.u32 127, %v146_v6 }
  0x29   :  { %272 = vmatprep.subr.bf16.mxu0 %v285_v1  ;;  %v142_v10 = vcombine.high %v264_v9, %v264_v9  ;;  %v265_v25 = vld [vmem:[%s457_s3] ss:$0 sm:$0xff]  ;;  %s377_s3 = smov [#allocation7]  }
  0x2a   :  { %v145_v7 = vunpack.c.0.s8 %v144_v5  ;;  %v159_v13 = vsub.s32 0, %v147_v8  ;;  %v209_v39 = vadd.s32 4294967288, %v199_v38  ;;  %v207_v41 = vsub.s32 %v199_v38, %v147_v8  ;;  %s248_s16 = sshll.u32 %s377_s3, 4  ;;  %s249_s16 = int_to_ptr.vmem [resolvable:$true] %s248_s16 }
  0x2b   :  { %vm200_vm3 = vcmp.lt.s32.totalorder %v199_v38, 8  ;;  %s344_s17 = scalar_lea.vmem %s249_s16, 32  ;;  %p349_p3 = scmp.lt.s32.totalorder %s249_s16, %s249_s16 }
  0x2c   :  { %273 = vmatpush3.bf16.msra.mxu0 %v285_v1  ;;  %v148_v11 = vsub.s32 %v145_v7, %v147_v8  ;;  %v212_v43 = vsub.s32 %v209_v39, %v147_v8  ;;  %p345_p2 = scmp.ne.s32.totalorder %s249_s16, %s344_s17  ;;  %p350_p4 = scmp.lt.s32.totalorder %s344_s17, %s344_s17 }
  0x2e   :  { %v156_v12 = vrot.slane %v142_v10, %v148_v11  ;;  %v149_v14 = vrot.slane %v264_v9, %v148_v11  ;;  %p351_p5 = por %p350_p4, %p349_p3 }
  0x2f   :  { %275 = vmatmul.mubr.msk.bf16.vlgmr.msra.gmra.mrb[0].mxu0 %vm77_vm0, %v287_v3 }
  0x30   :  { %v164_v15 = vrot.slane %v156_v12, %v159_v13  ;;  %v160_v16 = vrot.slane %v149_v14, %v159_v13  ;;  %p352_p6 = pnand %p351_p5, %p345_p2 }
 0x102   :  { %v276_v17 = vpop.f32.mrb[0].mxu0 }
 0x103   :  { %v169_v18 = vadd.f32 %v276_v17, %v164_v15  ;;  %v118_v19 = vpop.f32.mrb[1].mxu0 }
 0x104   :  { %v167_v20 = vadd.f32 %v160_v16, %v118_v19  ;;  %v277_v21 = vpop.f32.mrb[2].mxu0 }
 0x105   :  { %288 = vtanh.f32 %v169_v18  ;;  %v170_v22 = vadd.f32 %v277_v21, %v164_v15  ;;  %v121_v23 = vpop.f32.mrb[3].mxu0 }
 0x106   :  { %290 = vtanh.f32 %v167_v20  ;;  %v168_v24 = vadd.f32 %v160_v16, %v121_v23 }
 0x107   :  { %292 = vtanh.f32 %v170_v22 }
 0x108   :  { %294 = vtanh.f32 %v168_v24 }
 0x10f   :  { %v289_v26 = vpop.eup %288 }
 0x110   :  { %v291_v27 = vpop.eup %290  ;;  %v184_v28 = vmul.f32 %v289_v26, %v265_v25 }
 0x111   :  { %v293_v29 = vpop.eup %292  ;;  %v182_v30 = vmul.f32 %v291_v27, %v265_v25 }
 0x112   :  { %v295_v31 = vpop.eup %294  ;;  %v192_v32 = vsel %vm77_vm0, %v184_v28, 0.0  ;;  %v185_v33 = vmul.f32 %v293_v29, %v265_v25 }
 0x113   :  { %193 = vadd.xlane.f32.xlu1 %v192_v32  ;;  %v186_v34 = vsel %vm77_vm0, %v182_v30, 0.0  ;;  %v183_v35 = vmul.f32 %v295_v31, %v265_v25 }
 0x114   :  { %187 = vadd.xlane.f32.xlu0 %v186_v34  ;;  %v195_v36 = vsel %vm77_vm0, %v185_v33, 0.0 }
 0x115   :  { %v189_v37 = vsel %vm77_vm0, %v183_v35, 0.0 }
 0x117   :  { %196 = vadd.xlane.f32.xlu1 %v195_v36 }
 0x118   :  { %190 = vadd.xlane.f32.xlu0 %v189_v37 }
 0x1a0   :  { %v194_v40 = vpop.xlane.xlu1 %193 }
 0x1a1   :  { %v188_v42 = vpop.xlane.xlu0 %187  ;;  %v219_v45 = vrot.slane %v194_v40, %v207_v41 }
 0x1a2   :  { %v208_v48 = vrot.slane %v188_v42, %v207_v41 }
 0x1a4   :  { %v197_v44 = vpop.xlane.xlu1 %196 }
 0x1a5   :  { %v223_v46 = vrot.slane %v197_v44, %v212_v43  ;;  %v191_v47 = vpop.xlane.xlu0 %190 }
 0x1a6   :  { %v213_v49 = vrot.slane %v191_v47, %v212_v43 }
 0x1a7   :  { %v224_v50 = vsel %vm214_vm1, %v223_v46, %v219_v45 }
 0x1a8   :  { %v215_v51 = vsel %vm214_vm1, %v213_v49, %v208_v48 }
 0x1a9   :  { %v226_v52 = vsel %vm225_vm2, %v224_v50, %v215_v51 }
 0x1aa   :  { %v228_v53 = vsel %vm200_vm3, %v226_v52, -1e+30 }
 0x1ab   :  { %v230_v54 = vsel %vm229_vm4, %v228_v53, -inf }
 0x1ac   :  { %231 = vmax.xlane.f32.xlu0 %v230_v54 }
 0x239   :  { %v232_v55 = vpop.xlane.xlu0 %231 }
 0x23a   :  { %v233_v56 = vsub.f32 %v228_v53, %v232_v55 }
 0x23c   :  { %v234_v57 = vmul.f32 1.442695, %v233_v56 }
 0x23e   :  { %296 = vpow2.f32 %v234_v57 }
 0x248   :  { %v297_v58 = vpop.eup %296 }
 0x249   :  { %v236_v59 = vsel %vm229_vm4, %v297_v58, 0.0 }
 0x24a   :  { %237 = vadd.xlane.f32.xlu1 %v236_v59 }
 0x2d7   :  { %v238_v60 = vpop.xlane.xlu1 %237 }
 0x2d8   :  { %298 = vrcp.f32 %v238_v60 }
 0x2e2   :  { %v299_v61 = vpop.eup %298 }
 0x2e3   :  { %v240_v62 = vmul.f32 %v299_v61, %v297_v58 }
 0x2e5   :  { %241 = vst.msk [vmem:[#allocation7] sm:$0x3] %vm229_vm4, %v240_v62 }
 0x2e6   :  { %355 = shalt.err (!%p352_p6)
}
 0x2e7   :  { %s356_s20 = scalar_lea.hbm %s458_s4, 32 }
 0x2e8   :  { %p357_p7 = scmp.ne.s32.totalorder %s458_s4, %s356_s20  ;;  %p360_p8 = scmp.lt.u32.totalorder %s356_s20, %s458_s4 }
 0x2ea   :  { %p362_p9 = pnand %p360_p8, %p357_p7 }
 0x2ec   :  { %365 = shalt.err (!%p362_p9)
}
 0x2ed   :  { %251 = dma.vmem_to_hbm [thread:$0]  %s249_s16, 32, %s458_s4, [#allocation4]  }
 0x2ee   :  { %370 = dma.done.wait [#allocation4], 32  }
 0x2ef   :  { %371 = vsyncadd [#allocation4], 4294967264 }
 0x2f0   :  { %255 = vsyncpa [#allocation3], 1 }
 0x2f1   :  { %256 = vsyncpa [#allocation6], 1 }
 0x2f2   :  { %257 = vsyncpa [#allocation4], 1 }

</bundles_post_ra>
